<compile_context>
chip_gen: v7x
topology: tpu7x:2x2x1
jax: 0.10.0
libtpu: 0.0.40
codegen_flags: <defaults>
</compile_context>

<pallas_src>
import functools

import jax
import jax.numpy as jnp
from jax.experimental import pallas as pl
from jax.experimental.pallas import tpu as pltpu


def _round_up(x, m):
    return ((x + m - 1) // m) * m


def _vmem_config():
    """(tile VMEM budget, vmem_limit_bytes) tuned per TPU generation."""
    cap = 64 << 20                                   # conservative default (v7x-class)
    try:
        cap = int(pltpu.get_tpu_info().vmem_capacity_bytes)
    except Exception:
        pass
    if cap >= (96 << 20):                            # v5e / v6e: 128 MiB physical VMEM
        return 40 << 20, 64 << 20
    return 20 << 20, 32 << 20                        # v7x: 64 MiB physical VMEM


def _pick_pixel_tile(npix, k_p, cout_p, budget, min_tiles=4, max_tile=16384):
    """Pixels per grid step (multiple of 128 lanes), VMEM- and megacore-aware."""
    # Per-pixel VMEM bytes: double-buffered bf16 input column (2*2*k_p), the f32 accumulator
    # value chain the compiler keeps live (~3x cout_p*4), double-buffered f32 output (2*4*cout_p).
    per_pix = 4 * k_p + 20 * cout_p
    t = min(budget // per_pix, max_tile, _round_up(npix, 128))
    if npix >= min_tiles * 128:
        t = min(t, npix // min_tiles)   # keep >= min_tiles grid steps (v7x has 2 TensorCores)
    return max(128, (t // 128) * 128)


def _pick_hw_block(hw, cout_p, budget):
    """Largest 128-multiple divisor of hw whose pass-2 blocks fit the budget."""
    cands = [d for d in range(128, hw + 1, 128) if hw % d == 0]
    fitting = [d for d in cands if 16 * cout_p * d <= budget]
    return max(fitting) if fitting else min(cands)


# ----------------------------------------------------------------------------
# Pass 1: one K-folded bf16 matmul per tile + per-tile BN statistic partials.
#   x_ref   : (K_p, TP)      bf16   im2col columns (K on sublanes, pixels on lanes)
#   w_ref   : (cout_p, K_p)  bf16   tap-major weights, zero-padded
#   conv_ref: (cout_p, TP)   f32    channel-major, lane-dense conv output
#   psum_ref: (1, cout_p, 1) f32    per-tile per-channel sum
#   pssq_ref: (1, cout_p, 1) f32    per-tile per-channel sum of squares
# ----------------------------------------------------------------------------
def _conv_stats_kernel(x_ref, w_ref, conv_ref, psum_ref, pssq_ref):
    acc = jnp.dot(w_ref[...], x_ref[...], preferred_element_type=jnp.float32)
    conv_ref[...] = acc
    psum_ref[...] = jnp.sum(acc, axis=1, keepdims=True)[None]
    pssq_ref[...] = jnp.sum(acc * acc, axis=1, keepdims=True)[None]


# ----------------------------------------------------------------------------
# Pass 2: lane-dense BN affine on the channel-major conv output, written directly
# into the (N, Cout, H*W) layout so only a metadata reshape to NCHW remains.
# ----------------------------------------------------------------------------
def _bn_apply_kernel(y_ref, scale_ref, shift_ref, o_ref):
    cout = o_ref.shape[1]
    y = y_ref[...] * scale_ref[...] + shift_ref[...]
    o_ref[...] = y[:cout, :][None]


def conv3x3_bn_branch(x_nchw, weight, gamma, beta, eps=1e-5):
    """3x3 conv (stride 1, pad 1, no bias) + training-mode BatchNorm2d.  Returns NCHW f32."""
    N, Cin, H, W = x_nchw.shape
    Cout = weight.shape[0]
    K = 9 * Cin
    K_p = _round_up(K, 16)                 # bf16 sublane packing
    cout_p = _round_up(Cout, 8)
    npix = N * H * W

    budget, vmem_limit = _vmem_config()
    tp = _pick_pixel_tile(npix, K_p, cout_p, budget)
    ntiles = pl.cdiv(npix, tp)
    NP = ntiles * tp

    # --- glue: tap-folded "mini im2col", K-major (K on sublanes, pixels on lanes), bf16 ----
    xp = jnp.pad(x_nchw, ((0, 0), (0, 0), (1, 1), (1, 1)))
    taps = [xp[:, :, kh:kh + H, kw:kw + W] for kh in range(3) for kw in range(3)]
    xcol = jnp.stack(taps, axis=1).reshape(N, K, H * W)            # (N, 9*Cin, H*W)
    xcol = jnp.transpose(xcol, (1, 0, 2)).reshape(K, npix)         # (9*Cin, N*H*W)
    # zero-padded K rows / pixel columns contribute 0 to the conv and to the statistics
    xcol = jnp.pad(xcol, ((0, K_p - K), (0, NP - npix))).astype(jnp.bfloat16)

    # --- weights as the MXU LHS: (cout_p, K_p), tap-major K, zero-padded --------------------
    w2d = jnp.transpose(weight, (0, 2, 3, 1)).reshape(Cout, K).astype(jnp.float32)
    wk = (jnp.zeros((cout_p, K_p), jnp.float32).at[:Cout, :K].set(w2d)
          .astype(jnp.bfloat16))

    flops = 2 * NP * K_p * cout_p
    bytes_accessed = (K_p * NP * 2 + cout_p * K_p * 2
                      + cout_p * NP * 4 + 2 * ntiles * cout_p * 4)

    conv_t, psum, pssq = pl.pallas_call(
        _conv_stats_kernel,
        grid=(ntiles,),
        in_specs=[
            pl.BlockSpec((K_p, tp), lambda i: (0, i)),
            pl.BlockSpec((cout_p, K_p), lambda i: (0, 0)),
        ],
        out_specs=(
            pl.BlockSpec((cout_p, tp), lambda i: (0, i)),
            pl.BlockSpec((1, cout_p, 1), lambda i: (i, 0, 0)),
            pl.BlockSpec((1, cout_p, 1), lambda i: (i, 0, 0)),
        ),
        out_shape=(
            jax.ShapeDtypeStruct((cout_p, NP), jnp.float32),
            jax.ShapeDtypeStruct((ntiles, cout_p, 1), jnp.float32),
            jax.ShapeDtypeStruct((ntiles, cout_p, 1), jnp.float32),
        ),
        compiler_params=pltpu.CompilerParams(
            dimension_semantics=("parallel",),
            vmem_limit_bytes=vmem_limit),
        cost_estimate=pl.CostEstimate(flops=int(flops), transcendentals=0,
                                      bytes_accessed=int(bytes_accessed)),
    )(xcol, wk)

    # --- tiny per-channel scalar math (f32, outside the kernels) ----------------------------
    cnt = jnp.float32(npix)
    s = jnp.sum(psum, axis=0)[:Cout, 0]
    q = jnp.sum(pssq, axis=0)[:Cout, 0]
    mean = s / cnt
    var = jnp.maximum(q / cnt - mean * mean, 0.0)          # biased batch variance, clamped
    inv_std = jax.lax.rsqrt(var + jnp.float32(eps))
    scale = gamma.astype(jnp.float32) * inv_std
    shift = beta.astype(jnp.float32) - mean * scale

    # --- pass 2: BN affine written straight into (N, Cout, H*W) ----------------------------
    if (H * W) % 128 == 0:
        scale_p = jnp.zeros((cout_p, 1), jnp.float32).at[:Cout, 0].set(scale)
        shift_p = jnp.zeros((cout_p, 1), jnp.float32).at[:Cout, 0].set(shift)
        hw_blk = _pick_hw_block(H * W, cout_p, budget)
        nhw = (H * W) // hw_blk
        y = pl.pallas_call(
            _bn_apply_kernel,
            grid=(N, nhw),
            in_specs=[
                pl.BlockSpec((cout_p, hw_blk), lambda n, j: (0, n * nhw + j)),
                pl.BlockSpec((cout_p, 1), lambda n, j: (0, 0)),
                pl.BlockSpec((cout_p, 1), lambda n, j: (0, 0)),
            ],
            out_specs=pl.BlockSpec((1, Cout, hw_blk), lambda n, j: (n, 0, j)),
            out_shape=jax.ShapeDtypeStruct((N, Cout, H * W), jnp.float32),
            compiler_params=pltpu.CompilerParams(
                dimension_semantics=("parallel", "parallel"),
                vmem_limit_bytes=vmem_limit),
        )(conv_t, scale_p, shift_p)
        return y.reshape(N, Cout, H, W)                    # metadata-only

    # H*W not lane-aligned: fuse the affine into the single final permute in XLA instead of
    # paying a lane-masked Pallas pass plus a separate transpose (review option (a)).
    y = conv_t[:Cout, :npix] * scale[:, None] + shift[:, None]
    return jnp.transpose(y.reshape(Cout, N, H, W), (1, 0, 2, 3))


def avg_pool2x2(x_nchw):
    # glue: 2x2 / stride-2 average pool == reshape + mean (tiny data rearrangement)
    N, C, H, W = x_nchw.shape
    return x_nchw.reshape(N, C, H // 2, 2, W // 2, 2).mean(axis=(3, 5))


@functools.partial(jax.jit, static_argnames=("stride",))
def first_octave_cb(x, w_h2h, w_h2l, gamma_h, beta_h, gamma_l, beta_l, stride=1):
    """Forward pass of FirstOctaveCB. Returns (x_h, x_l) in NCHW."""
    if stride == 2:
        x = avg_pool2x2(x)
    x_l_in = avg_pool2x2(x)
    x_h = conv3x3_bn_branch(x, w_h2h, gamma_h, beta_h)
    x_l = conv3x3_bn_branch(x_l_in, w_h2l, gamma_l, beta_l)
    return x_h, x_l


if __name__ == "__main__":
    key = jax.random.PRNGKey(0)
    k_x, k_wh, k_wl = jax.random.split(key, 3)

    # small shapes consistent with the module
    N, Cin, H, W = 2, 4, 16, 16
    Cout, alpha = 8, 0.5
    Cl = int(alpha * Cout)       # low-frequency output channels
    Ch = Cout - Cl               # high-frequency output channels

    x = jax.random.normal(k_x, (N, Cin, H, W), dtype=jnp.float32)

    # deterministic synthetic parameters (Conv2d weights, BN affine at init values)
    w_h2h = 0.1 * jax.random.normal(k_wh, (Ch, Cin, 3, 3), dtype=jnp.float32)
    w_h2l = 0.1 * jax.random.normal(k_wl, (Cl, Cin, 3, 3), dtype=jnp.float32)
    gamma_h = jnp.ones((Ch,), jnp.float32)
    beta_h = jnp.zeros((Ch,), jnp.float32)
    gamma_l = jnp.ones((Cl,), jnp.float32)
    beta_l = jnp.zeros((Cl,), jnp.float32)

    x_h, x_l = first_octave_cb(x, w_h2h, w_h2l, gamma_h, beta_h, gamma_l, beta_l)
    jax.block_until_ready((x_h, x_l))

    assert x_h.shape == (N, Ch, H, W)
    assert x_l.shape == (N, Cl, H // 2, W // 2)
    assert bool(jnp.all(jnp.isfinite(x_h))) and bool(jnp.all(jnp.isfinite(x_l)))
    print("KERNEL_OK")
</pallas_src>

<mosaic_0001>
module attributes {stable_mosaic.version = 11 : i64} {
  func.func @_conv_stats_kernel(%arg0: i32, %arg1: memref<48x128xbf16, #tpu.memory_space<vmem>>, %arg2: memref<8x48xbf16, #tpu.memory_space<vmem>>, %arg3: memref<8x128xf32, #tpu.memory_space<vmem>>, %arg4: memref<1x8x1xf32, #tpu.memory_space<vmem>>, %arg5: memref<1x8x1xf32, #tpu.memory_space<vmem>>) attributes {dimension_semantics = [#tpu.dimension_semantics<parallel>], iteration_bounds = array<i64: 1>, scalar_prefetch = 0 : i64, scratch_operands = 0 : i64, tpu.core_type = #tpu.core_type<tc>, window_params = [{transform_indices = @transform_0, window_bounds = array<i64: 48, 128>}, {pipeline_mode = #tpu.pipeline_mode<synchronous>, transform_indices = @transform_1, window_bounds = array<i64: 8, 48>}, {transform_indices = @transform_2, window_bounds = array<i64: 8, 128>}, {transform_indices = @transform_3, window_bounds = array<i64: 1, 8, 1>}, {transform_indices = @transform_4, window_bounds = array<i64: 1, 8, 1>}]} {
    %c0 = arith.constant 0 : index
    %c0_0 = arith.constant 0 : index
    %0 = vector.load %arg2[%c0, %c0_0] : memref<8x48xbf16, #tpu.memory_space<vmem>>, vector<8x48xbf16>
    %c0_1 = arith.constant 0 : index
    %c0_2 = arith.constant 0 : index
    %1 = vector.load %arg1[%c0_1, %c0_2] : memref<48x128xbf16, #tpu.memory_space<vmem>>, vector<48x128xbf16>
    %cst = arith.constant dense<0.000000e+00> : vector<8x128xf32>
    %2 = tpu.matmul %0, %1, %cst {dimension_numbers = #tpu.dot_dimension_numbers<[1], [0], [0], [1], [0, 0, 1, 1], [], []>} : vector<8x48xbf16>, vector<48x128xbf16>, vector<8x128xf32> -> vector<8x128xf32>
    %c0_3 = arith.constant 0 : index
    %c0_4 = arith.constant 0 : index
    %3 = vector.load %arg3[%c0_3, %c0_4] : memref<8x128xf32, #tpu.memory_space<vmem>>, vector<8x128xf32>
    tpu.vector_store %arg3[%c0_3, %c0_4], %2 {strides = array<i32>} : memref<8x128xf32, #tpu.memory_space<vmem>>, vector<8x128xf32>,
    %cst_5 = arith.constant dense<0.000000e+00> : vector<8xf32>
    %4 = vector.multi_reduction <add>, %2, %cst_5 [1] : vector<8x128xf32> to vector<8xf32>
    %5 = vector.shape_cast %4 : vector<8xf32> to vector<8x1xf32>
    %6 = vector.shape_cast %5 : vector<8x1xf32> to vector<1x8x1xf32>
    %c0_6 = arith.constant 0 : index
    %c0_7 = arith.constant 0 : index
    %c0_8 = arith.constant 0 : index
    %7 = vector.load %arg4[%c0_6, %c0_7, %c0_8] : memref<1x8x1xf32, #tpu.memory_space<vmem>>, vector<1x8x1xf32>
    tpu.vector_store %arg4[%c0_6, %c0_7, %c0_8], %6 {strides = array<i32>} : memref<1x8x1xf32, #tpu.memory_space<vmem>>, vector<1x8x1xf32>,
    %8 = arith.mulf %2, %2 : vector<8x128xf32>
    %cst_9 = arith.constant dense<0.000000e+00> : vector<8xf32>
    %9 = vector.multi_reduction <add>, %8, %cst_9 [1] : vector<8x128xf32> to vector<8xf32>
    %10 = vector.shape_cast %9 : vector<8xf32> to vector<8x1xf32>
    %11 = vector.shape_cast %10 : vector<8x1xf32> to vector<1x8x1xf32>
    %c0_10 = arith.constant 0 : index
    %c0_11 = arith.constant 0 : index
    %c0_12 = arith.constant 0 : index
    %12 = vector.load %arg5[%c0_10, %c0_11, %c0_12] : memref<1x8x1xf32, #tpu.memory_space<vmem>>, vector<1x8x1xf32>
    tpu.vector_store %arg5[%c0_10, %c0_11, %c0_12], %11 {strides = array<i32>} : memref<1x8x1xf32, #tpu.memory_space<vmem>>, vector<1x8x1xf32>,
    return
  }
  func.func @transform_0(%arg0: i32) -> (i32, i32) {
    %c0_i32 = arith.constant 0 : i32
    %c0_i32_0 = arith.constant 0 : i32
    return %c0_i32, %arg0 : i32, i32
  }
  func.func @transform_1(%arg0: i32) -> (i32, i32) {
    %c0_i32 = arith.constant 0 : i32
    %c0_i32_0 = arith.constant 0 : i32
    %c0_i32_1 = arith.constant 0 : i32
    return %c0_i32, %c0_i32_0 : i32, i32
  }
  func.func @transform_2(%arg0: i32) -> (i32, i32) {
    %c0_i32 = arith.constant 0 : i32
    %c0_i32_0 = arith.constant 0 : i32
    return %c0_i32, %arg0 : i32, i32
  }
  func.func @transform_3(%arg0: i32) -> (i32, i32, i32) {
    %c0_i32 = arith.constant 0 : i32
    %c0_i32_0 = arith.constant 0 : i32
    %c0_i32_1 = arith.constant 0 : i32
    return %arg0, %c0_i32, %c0_i32_0 : i32, i32, i32
  }
  func.func @transform_4(%arg0: i32) -> (i32, i32, i32) {
    %c0_i32 = arith.constant 0 : i32
    %c0_i32_0 = arith.constant 0 : i32
    %c0_i32_1 = arith.constant 0 : i32
    return %arg0, %c0_i32, %c0_i32_0 : i32, i32, i32
  }
}

module attributes {stable_mosaic.version = 11 : i64} {
  func.func @_bn_apply_kernel(%arg0: i32, %arg1: i32, %arg2: memref<8x256xf32, #tpu.memory_space<vmem>>, %arg3: memref<8x1xf32, #tpu.memory_space<vmem>>, %arg4: memref<8x1xf32, #tpu.memory_space<vmem>>, %arg5: memref<1x4x256xf32, #tpu.memory_space<vmem>>) attributes {dimension_semantics = [#tpu.dimension_semantics<parallel>, #tpu.dimension_semantics<parallel>], iteration_bounds = array<i64: 2, 1>, scalar_prefetch = 0 : i64, scratch_operands = 0 : i64, tpu.core_type = #tpu.core_type<tc>, window_params = [{transform_indices = @transform_0, window_bounds = array<i64: 8, 256>}, {pipeline_mode = #tpu.pipeline_mode<synchronous>, transform_indices = @transform_1, window_bounds = array<i64: 8, 1>}, {pipeline_mode = #tpu.pipeline_mode<synchronous>, transform_indices = @transform_2, window_bounds = array<i64: 8, 1>}, {transform_indices = @transform_3, window_bounds = array<i64: 1, 4, 256>}]} {
    %c0 = arith.constant 0 : index
    %c0_0 = arith.constant 0 : index
    %0 = vector.load %arg2[%c0, %c0_0] : memref<8x256xf32, #tpu.memory_space<vmem>>, vector<8x256xf32>
    %c0_1 = arith.constant 0 : index
    %c0_2 = arith.constant 0 : index
    %1 = vector.load %arg3[%c0_1, %c0_2] : memref<8x1xf32, #tpu.memory_space<vmem>>, vector<8x1xf32>
    %2 = vector.broadcast %1 : vector<8x1xf32> to vector<8x256xf32>
    %3 = arith.mulf %0, %2 : vector<8x256xf32>
    %c0_3 = arith.constant 0 : index
    %c0_4 = arith.constant 0 : index
    %4 = vector.load %arg4[%c0_3, %c0_4] : memref<8x1xf32, #tpu.memory_space<vmem>>, vector<8x1xf32>
    %5 = vector.broadcast %4 : vector<8x1xf32> to vector<8x256xf32>
    %6 = arith.addf %3, %5 : vector<8x256xf32>
    %7 = vector.extract_strided_slice %6 {offsets = [0, 0], sizes = [4, 256], strides = [1, 1]} : vector<8x256xf32> to vector<4x256xf32>
    %8 = vector.shape_cast %7 : vector<4x256xf32> to vector<1x4x256xf32>
    %c0_5 = arith.constant 0 : index
    %c0_6 = arith.constant 0 : index
    %c0_7 = arith.constant 0 : index
    %9 = vector.load %arg5[%c0_5, %c0_6, %c0_7] : memref<1x4x256xf32, #tpu.memory_space<vmem>>, vector<1x4x256xf32>
    tpu.vector_store %arg5[%c0_5, %c0_6, %c0_7], %8 {strides = array<i32>} : memref<1x4x256xf32, #tpu.memory_space<vmem>>, vector<1x4x256xf32>,
    return
  }
  func.func @transform_0(%arg0: i32, %arg1: i32) -> (i32, i32) {
    %c1_i32 = arith.constant 1 : i32
    %0 = arith.muli %arg0, %c1_i32 : i32
    %1 = arith.addi %0, %arg1 : i32
    %c0_i32 = arith.constant 0 : i32
    %c0_i32_0 = arith.constant 0 : i32
    return %c0_i32, %1 : i32, i32
  }
  func.func @transform_1(%arg0: i32, %arg1: i32) -> (i32, i32) {
    %c0_i32 = arith.constant 0 : i32
    %c0_i32_0 = arith.constant 0 : i32
    %c0_i32_1 = arith.constant 0 : i32
    return %c0_i32, %c0_i32_0 : i32, i32
  }
  func.func @transform_2(%arg0: i32, %arg1: i32) -> (i32, i32) {
    %c0_i32 = arith.constant 0 : i32
    %c0_i32_0 = arith.constant 0 : i32
    %c0_i32_1 = arith.constant 0 : i32
    return %c0_i32, %c0_i32_0 : i32, i32
  }
  func.func @transform_3(%arg0: i32, %arg1: i32) -> (i32, i32, i32) {
    %c0_i32 = arith.constant 0 : i32
    %c0_i32_0 = arith.constant 0 : i32
    return %arg0, %c0_i32, %arg1 : i32, i32, i32
  }
}

module attributes {stable_mosaic.version = 11 : i64} {
  func.func @_conv_stats_kernel(%arg0: i32, %arg1: memref<48x128xbf16, #tpu.memory_space<vmem>>, %arg2: memref<8x48xbf16, #tpu.memory_space<vmem>>, %arg3: memref<8x128xf32, #tpu.memory_space<vmem>>, %arg4: memref<1x8x1xf32, #tpu.memory_space<vmem>>, %arg5: memref<1x8x1xf32, #tpu.memory_space<vmem>>) attributes {dimension_semantics = [#tpu.dimension_semantics<parallel>], iteration_bounds = array<i64: 4>, scalar_prefetch = 0 : i64, scratch_operands = 0 : i64, tpu.core_type = #tpu.core_type<tc>, window_params = [{transform_indices = @transform_0, window_bounds = array<i64: 48, 128>}, {pipeline_mode = #tpu.pipeline_mode<synchronous>, transform_indices = @transform_1, window_bounds = array<i64: 8, 48>}, {transform_indices = @transform_2, window_bounds = array<i64: 8, 128>}, {transform_indices = @transform_3, window_bounds = array<i64: 1, 8, 1>}, {transform_indices = @transform_4, window_bounds = array<i64: 1, 8, 1>}]} {
    %c0 = arith.constant 0 : index
    %c0_0 = arith.constant 0 : index
    %0 = vector.load %arg2[%c0, %c0_0] : memref<8x48xbf16, #tpu.memory_space<vmem>>, vector<8x48xbf16>
    %c0_1 = arith.constant 0 : index
    %c0_2 = arith.constant 0 : index
    %1 = vector.load %arg1[%c0_1, %c0_2] : memref<48x128xbf16, #tpu.memory_space<vmem>>, vector<48x128xbf16>
    %cst = arith.constant dense<0.000000e+00> : vector<8x128xf32>
    %2 = tpu.matmul %0, %1, %cst {dimension_numbers = #tpu.dot_dimension_numbers<[1], [0], [0], [1], [0, 0, 1, 1], [], []>} : vector<8x48xbf16>, vector<48x128xbf16>, vector<8x128xf32> -> vector<8x128xf32>
    %c0_3 = arith.constant 0 : index
    %c0_4 = arith.constant 0 : index
    %3 = vector.load %arg3[%c0_3, %c0_4] : memref<8x128xf32, #tpu.memory_space<vmem>>, vector<8x128xf32>
    tpu.vector_store %arg3[%c0_3, %c0_4], %2 {strides = array<i32>} : memref<8x128xf32, #tpu.memory_space<vmem>>, vector<8x128xf32>,
    %cst_5 = arith.constant dense<0.000000e+00> : vector<8xf32>
    %4 = vector.multi_reduction <add>, %2, %cst_5 [1] : vector<8x128xf32> to vector<8xf32>
    %5 = vector.shape_cast %4 : vector<8xf32> to vector<8x1xf32>
    %6 = vector.shape_cast %5 : vector<8x1xf32> to vector<1x8x1xf32>
    %c0_6 = arith.constant 0 : index
    %c0_7 = arith.constant 0 : index
    %c0_8 = arith.constant 0 : index
    %7 = vector.load %arg4[%c0_6, %c0_7, %c0_8] : memref<1x8x1xf32, #tpu.memory_space<vmem>>, vector<1x8x1xf32>
    tpu.vector_store %arg4[%c0_6, %c0_7, %c0_8], %6 {strides = array<i32>} : memref<1x8x1xf32, #tpu.memory_space<vmem>>, vector<1x8x1xf32>,
    %8 = arith.mulf %2, %2 : vector<8x128xf32>
    %cst_9 = arith.constant dense<0.000000e+00> : vector<8xf32>
    %9 = vector.multi_reduction <add>, %8, %cst_9 [1] : vector<8x128xf32> to vector<8xf32>
    %10 = vector.shape_cast %9 : vector<8xf32> to vector<8x1xf32>
    %11 = vector.shape_cast %10 : vector<8x1xf32> to vector<1x8x1xf32>
    %c0_10 = arith.constant 0 : index
    %c0_11 = arith.constant 0 : index
    %c0_12 = arith.constant 0 : index
    %12 = vector.load %arg5[%c0_10, %c0_11, %c0_12] : memref<1x8x1xf32, #tpu.memory_space<vmem>>, vector<1x8x1xf32>
    tpu.vector_store %arg5[%c0_10, %c0_11, %c0_12], %11 {strides = array<i32>} : memref<1x8x1xf32, #tpu.memory_space<vmem>>, vector<1x8x1xf32>,
    return
  }
  func.func @transform_0(%arg0: i32) -> (i32, i32) {
    %c0_i32 = arith.constant 0 : i32
    %c0_i32_0 = arith.constant 0 : i32
    return %c0_i32, %arg0 : i32, i32
  }
  func.func @transform_1(%arg0: i32) -> (i32, i32) {
    %c0_i32 = arith.constant 0 : i32
    %c0_i32_0 = arith.constant 0 : i32
    %c0_i32_1 = arith.constant 0 : i32
    return %c0_i32, %c0_i32_0 : i32, i32
  }
  func.func @transform_2(%arg0: i32) -> (i32, i32) {
    %c0_i32 = arith.constant 0 : i32
    %c0_i32_0 = arith.constant 0 : i32
    return %c0_i32, %arg0 : i32, i32
  }
  func.func @transform_3(%arg0: i32) -> (i32, i32, i32) {
    %c0_i32 = arith.constant 0 : i32
    %c0_i32_0 = arith.constant 0 : i32
    %c0_i32_1 = arith.constant 0 : i32
    return %arg0, %c0_i32, %c0_i32_0 : i32, i32, i32
  }
  func.func @transform_4(%arg0: i32) -> (i32, i32, i32) {
    %c0_i32 = arith.constant 0 : i32
    %c0_i32_0 = arith.constant 0 : i32
    %c0_i32_1 = arith.constant 0 : i32
    return %arg0, %c0_i32, %c0_i32_0 : i32, i32, i32
  }
}

</mosaic_0001>

<bundles_post_ra>
// kernel: first_octave_cb.5
= control target key start
LH: loop header
LB: loop body
LE: loop exit
PB: predicated region body
PF: predicated region fallthrough
CT: control target
= control target key end

     0   :  { %v128_v0 = vmov 0.0   ;;  %vm129_vm0 = vmmov 0   ;;  %vm40_vm1 = vcmask 392192   ;;  %vm87_vm2 = vcmask 7168   ;;  %s176_s0 = inlined_call_operand.vmem [shape: bf16[48,128], index: 0, kind: input, shape index: {}]   ;;  %s177_s1 = inlined_call_operand.vmem [shape: bf16[8,48], index: 1, kind: input, shape index: {}]   ;;  %s178_s2 = inlined_call_operand.vmem [shape: f32[8,128], index: 2, kind: output, shape index: {0}]   ;;  %s179_s3 = inlined_call_operand.vmem [shape: f32[1,8,1], index: 3, kind: output, shape index: {1}]   ;;  %s180_s4 = inlined_call_operand.vmem [shape: f32[1,8,1], index: 4, kind: output, shape index: {2}]  }
   0x1   :  { %113 = vmatprep.subr.bf16.mxu0 %v128_v0  ;;  %v125_v1 = vld [vmem:[%s176_s0] sm:$0xff]   ;;  %119 = vmatprep.mubr.msk.bf16.mxu0 %vm129_vm0, %v128_v0  ;;  %v126_v2 = vld [vmem:[%s176_s0 + $0x8] sm:$0xff]   ;;  %v127_v3 = vld [vmem:[%s176_s0 + $0x10] sm:$0xff]  }
   0x2   :  { %114 = vmatpush3.bf16.msra.mxu0 %v125_v1  ;;  %v15_v4 = vld [vmem:[%s177_s1] sm:$0xf] }
   0x3   :  { %115 = vmatprep.subr.bf16.mxu0 %v128_v0 }
   0x6   :  { %116 = vmatpush3.bf16.msra.mxu0 %v126_v2 }
   0x7   :  { %117 = vmatprep.subr.bf16.mxu0 %v128_v0 }
   0xa   :  { %118 = vmatpush3.bf16.msra.mxu0 %v127_v3 }
   0xd   :  { %120 = vmatmul.mubr.msk.bf16.vlgmr.msra.gmra.mrb[0].mxu0 %vm40_vm1, %v15_v4 }
  0xe0   :  { %v78_v5 = vpop.f32.mrb[0].mxu0 }
  0xe1   :  { %84 = vst [vmem:[%s178_s2] sm:$0xff] %v78_v5  ;;  %85 = vadd.xlane.f32.xlu0 %v78_v5  ;;  %v121_v6 = vpop.f32.mrb[1].mxu0  ;;  %v89_v9 = vmul.f32 %v78_v5, %v78_v5 }
  0xe2   :  { %v81_v7 = vpop.f32.mrb[2].mxu0 }
  0xe3   :  { %v122_v8 = vpop.f32.mrb[3].mxu0 }
  0xe5   :  { %90 = vadd.xlane.f32.xlu0 %v89_v9 }
 0x16e   :  { %v86_v10 = vpop.xlane.xlu0 %85 }
 0x16f   :  { %88 = vst.msk [vmem:[%s179_s3] sm:$0xff] %vm87_vm2, %v86_v10 }
 0x172   :  { %v91_v11 = vpop.xlane.xlu0 %90 }
 0x173   :  { %92 = vst.msk [vmem:[%s180_s4] sm:$0xff] %vm87_vm2, %v91_v11 }

// kernel: first_octave_cb.4
= control target key start
LH: loop header
LB: loop body
LE: loop exit
PB: predicated region body
PF: predicated region fallthrough
CT: control target
= control target key end

     0   :  { %s390_s12 = smov 0   ;;  %s392_s13 = smov 0   ;;  %s429_s0 = inlined_call_operand.vmem [shape: f32[8,512], index: 0, kind: input, shape index: {}]   ;;  %s430_s1 = inlined_call_operand.vmem [shape: f32[8,1], index: 1, kind: input, shape index: {}]   ;;  %s431_s2 = inlined_call_operand.vmem [shape: f32[8,1], index: 2, kind: input, shape index: {}]   ;;  %s432_s3 = inlined_call_operand.vmem [shape: f32[2,4,256], index: 3, kind: output, shape index: {}]  }
   0x1   :  { %s394_s14 = smov 0  }
   0x2 LB: > { %s25_s15 = sadd.s32 1, %s363_s13  ;;  %p311_p0 = scmp.ge.s32.totalorder %s367_s14, 1  ;;  %s367_s14 = sphi %s394_s14, %s13_s14   ;;  %s363_s13 = sphi %s392_s13, %s434_s13   ;;  %s359_s12 = sphi %s390_s12, %s433_s12  }
   0x3   : > { %p27_p1 = scmp.ge.s32.totalorder %s25_s15, 2  ;;  %p156_p2 = scmp.lt.s32.totalorder %s367_s14, 3 }
   0x5   : > { %s436_s15 = smov (%p27_p1, %s25_s15), 0  ;;  %p157_p3 = pnand %p311_p0, %p156_p2 }
   0x6   : > { %v205_v0 = vld [vmem:[%s430_s1] sm:$0xff] (!%p157_p3)  ;;  %v369_v1 = vmov (!%p157_p3), 0   ;;  %s312_s20 = sshll.u32 (!%p157_p3), %s359_s12, 1  ;;  %p194_p5 = scmp.lt.s32.totalorder (!%p157_p3), %s359_s12, 1 }
   0x7   : > { %160 = sbr.rel (%p157_p3) target bundleno = 145 (0x91), region = 32  ;;  %344 = vset.pattern.permute.xlu0 (!%p157_p3), %v369_v1  ;;  %v213_v2 = vld [vmem:[%s431_s2] sm:$0xff] (!%p157_p3)  ;;  %p187_p4 = scmp.lt.s32.totalorder (!%p157_p3), %s312_s20, 3 }
   0x8   : > { %208 = vperm.xlu0 (!%p157_p3), %344, %v205_v0  }
   0xc   : > { %216 = vperm.xlu0 (!%p157_p3), %344, %v213_v2  }
   0xe   : > { %s438_s20 = smov (!%p187_p4, %s312_s20), 3  ;;  %s440_s12 = smov (!%p194_p5, %s359_s12), 1 }
   0xf   : > { %s313_s21 = sshll.u32 %s438_s20, 3  ;;  %s318_s25 = sshll.u32 %s440_s12, 3 }
  0x10   : > { %s190_s24 = scalar_lea.vmem %s429_s0, %s313_s21  ;;  %s201_s28 = scalar_lea.vmem %s432_s3, %s318_s25 }
  0x11   : > { %v203_v4 = vld [vmem:[%s190_s24] sm:$0xff]  ;;  %v204_v5 = vld [vmem:[%s190_s24 + $0x8] sm:$0xff] }
  0x87   : > { %v209_v3 = vpop.permute.xlu0 %208 }
  0x88   : > { %v211_v6 = vmul.f32 %v209_v3, %v203_v4  ;;  %v212_v7 = vmul.f32 %v209_v3, %v204_v5 }
  0x8b   : > { %v217_v8 = vpop.permute.xlu0 %216 }
  0x8c   : > { %v219_v9 = vadd.f32 %v217_v8, %v211_v6  ;;  %v220_v10 = vadd.f32 %v217_v8, %v212_v7 }
  0x8e   : > { %v223_v11 = vcombine.low %v219_v9, %v220_v10 }
  0x90   : > { %225 = vst [vmem:[%s201_s28] sm:$0xff] %v223_v11 }
  0x91 PF: > { %s13_s14 = sadd.s32 1, %s367_s14   ;;  %s433_s12 = smov %s363_s13 }
  0x92   : > { %p10_p6 = scmp.ge.s32.totalorder %s13_s14, 4   ;;  %s434_s13 = smov %s436_s15 }
  0x94   :  { %12 = sbr.rel (!%p10_p6) target bundleno = 2 (0x2), region = 62 }

// kernel: first_octave_cb.3
= control target key start
LH: loop header
LB: loop body
LE: loop exit
PB: predicated region body
PF: predicated region fallthrough
CT: control target
= control target key end

     0   :  { %s589_s15 = smov 0   ;;  %s591_s16 = smov 0   ;;  %s652_s0 = inlined_call_operand.vmem [shape: bf16[48,512], index: 0, kind: input, shape index: {}]   ;;  %s653_s1 = inlined_call_operand.vmem [shape: bf16[8,48], index: 1, kind: input, shape index: {}]   ;;  %s654_s2 = inlined_call_operand.vmem [shape: f32[8,512], index: 2, kind: output, shape index: {0}]   ;;  %s655_s3 = inlined_call_operand.vmem [shape: f32[4,8,1], index: 3, kind: output, shape index: {1}]   ;;  %s656_s4 = inlined_call_operand.vmem [shape: f32[4,8,1], index: 4, kind: output, shape index: {2}]  }
   0x1   :  { %s593_s17 = smov 0  }
   0x2 LB: > { %s478_s18 = sadd.s32 4294967295, %s560_s17   ;;  %s606_s19 = sadd.s32 1, %s560_s17   ;;  %s560_s17 = sphi %s593_s17, %s659_s17   ;;  %s556_s16 = sphi %s591_s16, %s658_s16   ;;  %s552_s15 = sphi %s589_s15, %s657_s15  }
   0x3   : > { %s19_s20 = ssub.s32 %s560_s17, %s606_s19  ;;  %s22_s21 = sadd.s32 1, %s556_s16 }
   0x4   : > { %p20_p0 = scmp.eq.s32.totalorder %s19_s20, 0  ;;  %p29_p1 = scmp.ne.s32.totalorder %s556_s16, %s552_s15 }
   0x5   : > { %p30_p2 = scmp.eq.s32.totalorder %s560_s17, 0  ;;  %p481_p4 = scmp.ge.s32.totalorder %s560_s17, 4 }
   0x6   : > { %s615_s22 = scalar_select %p20_p0, %s556_s16, %s22_s21  }
   0x7   : > { %p31_p3 = por %p30_p2, %p29_p1  ;;  %157 = sbr.rel (%p481_p4) target bundleno = 22 (0x16), region = 20 }
   0xe   : > { %160 = sbr.rel (!%p31_p3) target bundleno = 22 (0x16), region = 24  ;;  %s162_s23 = sand.u32 (%p31_p3), 1, %s556_s16  }
   0xf   : > { %s482_s24 = sshll.u32 (%p31_p3), %s560_s17, 2  ;;  %s507_s25 = smul.u32 (%p31_p3), 24, %s162_s23 }
  0x10   : > { %s166_s28 = scalar_lea.vmem (%p31_p3), %s652_s0, %s482_s24 }
  0x11   : > { %v182_v0 = vld [vmem:[%s166_s28] sm:$0xf] (%p31_p3)  ;;  %v184_v1 = vld [vmem:[%s166_s28 + $0x10] sm:$0xf] (%p31_p3)  ;;  %s164_s29 = scalar_lea.vmem (%p31_p3), [#allocation2], %s507_s25 }
  0x12   : > { %v186_v2 = vld [vmem:[%s166_s28 + $0x20] sm:$0xf] (%p31_p3)  ;;  %v188_v3 = vld [vmem:[%s166_s28 + $0x30] sm:$0xf] (%p31_p3)  ;;  %183 = vst [vmem:[%s164_s29] sm:$0xf] (%p31_p3), %v182_v0 }
  0x13   : > { %v190_v4 = vld [vmem:[%s166_s28 + $0x40] sm:$0xf] (%p31_p3)  ;;  %185 = vst [vmem:[%s164_s29 + $0x4] sm:$0xf] (%p31_p3), %v184_v1  ;;  %187 = vst [vmem:[%s164_s29 + $0x8] sm:$0xf] (%p31_p3), %v186_v2 }
  0x14   : > { %189 = vst [vmem:[%s164_s29 + $0xc] sm:$0xf] (%p31_p3), %v188_v3  ;;  %191 = vst [vmem:[%s164_s29 + $0x10] sm:$0xf] (%p31_p3), %v190_v4  ;;  %v192_v5 = vld [vmem:[%s166_s28 + $0x50] sm:$0xf] (%p31_p3) }
  0x15   : > { %193 = vst [vmem:[%s164_s29 + $0x14] sm:$0xf] %v192_v5 }
  0x16 PF: > { %p483_p5 = scmp.ge.s32.totalorder %s560_s17, 1  ;;  %p227_p6 = scmp.lt.s32.totalorder %s560_s17, 5 }
  0x18   : > { %p228_p7 = pnand %p483_p5, %p227_p6 }
  0x19   : > { %s234_s30 = sand.u32 (!%p228_p7), 1, %s552_s15   ;;  %v562_v6 = vmov (!%p228_p7), 0.0   ;;  %vm563_vm0 = vmmov (!%p228_p7), 0   ;;  %v279_v10 = vld [vmem:[%s653_s1] sm:$0xf] (!%p228_p7)  ;;  %vm304_vm1 = vcmask (!%p228_p7), 392192  }
  0x1a   : > { %231 = sbr.rel (%p228_p7) target bundleno = 401 (0x191), region = 65  ;;  %497 = vmatprep.subr.bf16.mxu0 (!%p228_p7), %v562_v6  ;;  %503 = vmatprep.mubr.msk.bf16.mxu0 (!%p228_p7), %vm563_vm0, %v562_v6  ;;  %p266_p8 = scmp.lt.s32.totalorder (!%p228_p7), %s478_s18, 3  ;;  %vm351_vm2 = vcmask (!%p228_p7), 7168  }
  0x1b   : > { %s508_s5 = smul.u32 (!%p228_p7), 24, %s234_s30 }
  0x1d   : > { %s236_s6 = scalar_lea.vmem (!%p228_p7), [#allocation2], %s508_s5 }
  0x1e   : > { %v535_v7 = vld [vmem:[%s236_s6] sm:$0xff] (!%p228_p7)   ;;  %v536_v8 = vld [vmem:[%s236_s6 + $0x8] sm:$0xff] (!%p228_p7)   ;;  %v537_v9 = vld [vmem:[%s236_s6 + $0x10] sm:$0xff] (!%p228_p7)  }
  0x1f   : > { %498 = vmatpush3.bf16.msra.mxu0 (!%p228_p7), %v535_v7 }
  0x20   : > { %499 = vmatprep.subr.bf16.mxu0 (!%p228_p7), %v562_v6 }
  0x21   : > { %s661_s18 = smov (!%p266_p8, %s478_s18), 3 }
  0x22   : > { %s484_s9 = sshll.u32 %s661_s18, 3 }
  0x23   : > { %500 = vmatpush3.bf16.msra.mxu0 %v536_v8  ;;  %s269_s12 = scalar_lea.vmem %s654_s2, %s484_s9  ;;  %s273_s15 = scalar_lea.vmem %s655_s3, %s484_s9 }
  0x24   : > { %501 = vmatprep.subr.bf16.mxu0 %v562_v6  ;;  %s277_s20 = scalar_lea.vmem %s656_s4, %s484_s9 }
  0x27   : > { %502 = vmatpush3.bf16.msra.mxu0 %v537_v9 }
  0x2a   : > { %504 = vmatmul.mubr.msk.bf16.vlgmr.msra.gmra.mrb[0].mxu0 %vm304_vm1, %v279_v10 }
  0xfd   : > { %v342_v11 = vpop.f32.mrb[0].mxu0 }
  0xfe   : > { %348 = vst [vmem:[%s269_s12] sm:$0xff] %v342_v11  ;;  %349 = vadd.xlane.f32.xlu0 %v342_v11  ;;  %v505_v12 = vpop.f32.mrb[1].mxu0  ;;  %v353_v15 = vmul.f32 %v342_v11, %v342_v11 }
  0xff   : > { %v345_v13 = vpop.f32.mrb[2].mxu0 }
 0x100   : > { %v506_v14 = vpop.f32.mrb[3].mxu0 }
 0x102   : > { %354 = vadd.xlane.f32.xlu0 %v353_v15 }
 0x18b   : > { %v350_v16 = vpop.xlane.xlu0 %349 }
 0x18c   : > { %352 = vst.msk [vmem:[%s273_s15] sm:$0xff] %vm351_vm2, %v350_v16 }
 0x18f   : > { %v355_v17 = vpop.xlane.xlu0 %354 }
 0x190   : > { %356 = vst.msk [vmem:[%s277_s20] sm:$0xff] %vm351_vm2, %v355_v17 }
 0x191 PF: > { %p12_p9 = scmp.ge.s32.totalorder %s606_s19, 6   ;;  %s657_s15 = smov %s556_s16 }
 0x192   : > { %s658_s16 = smov %s615_s22  ;;  %s659_s17 = smov %s606_s19 }
 0x193   :  { %14 = sbr.rel (!%p12_p9) target bundleno = 2 (0x2), region = 128 }

</bundles_post_ra>
